<compile_context>
chip_gen: v7x
topology: tpu7x:2x2x1
jax: 0.10.0
libtpu: 0.0.40
codegen_flags: <defaults>
</compile_context>

<pallas_src>
import jax
import jax.numpy as jnp
from jax.experimental import pallas as pl
from jax.experimental.pallas import tpu as pltpu

_BIG_NEGATIVE = -100000000.0  # defined in the PyTorch module; unused in forward


# ----------------------------- kernels ------------------------------------ #

def _no_mask_kernel(x_ref, w_ref, b_ref, o_ref):
    # x_ref: (TB, N, D_in)  w_ref: (D_in, 2*out)  b_ref: (1, 2*out) [pre-scaled by N]
    # o_ref: (TB, out)
    out_dim = w_ref.shape[1] // 2
    # sum_n (x_n @ W + b) == (sum_n x_n) @ W + N*b  -> collapse nodes before matmul
    xs = jnp.sum(x_ref[...], axis=1)                                  # (TB, D_in) f32
    y = jnp.dot(xs.astype(w_ref.dtype), w_ref[...],
                preferred_element_type=jnp.float32) + b_ref[...]      # (TB, 2*out)
    s, js = y[:, :out_dim], y[:, out_dim:]
    mx = jnp.max(s, axis=-1, keepdims=True)
    e = jnp.exp(s - mx)
    a = e / jnp.sum(e, axis=-1, keepdims=True)       # exact softmax (TB divisions)
    o_ref[...] = (a * js).astype(o_ref.dtype)


def _mask_kernel(x_ref, m_ref, w_ref, b_ref, o_ref):
    # x_ref: (TB, N, D_in)  m_ref: (TB, N, 1)  w_ref: (D_in, 2*out)
    # b_ref: (1, 2*out)     o_ref: (TB, out)
    TB, N, D_in = x_ref.shape
    out_dim = w_ref.shape[1] // 2
    x2 = x_ref[...].reshape(TB * N, D_in)                             # big-M MXU tile
    m2 = m_ref[...].reshape(TB * N, 1)                                # f32 node mask
    # (m*x) @ W + b == m*(x@W) + b : matmul on unmasked x, scale rows afterwards
    y = jnp.dot(x2.astype(w_ref.dtype), w_ref[...],
                preferred_element_type=jnp.float32)                   # (TB*N, 2*out)
    y = y * m2 + b_ref[...]
    si, sj = y[:, :out_dim], y[:, out_dim:]
    mx = jnp.max(si, axis=-1, keepdims=True)
    e = jnp.exp(si - mx)
    a = e / jnp.sum(e, axis=-1, keepdims=True)       # exact softmax (TB*N divisions)
    gated = (a * sj * m2).reshape(TB, N, out_dim)
    o_ref[...] = jnp.sum(gated, axis=1).astype(o_ref.dtype)


# --------------------------- tiling helpers -------------------------------- #

def _pick_block_batch(B, N, D_in, itemsize=4, x_tile_budget=8 << 20):
    """Largest TB that divides B, is a multiple of 8 (sublane-dense output block),
    keeps the double-buffered x tile within budget, and leaves >= 2 grid steps so
    v7x's two TensorCores both get work."""
    candidates = [tb for tb in range(8, B // 2 + 1, 8)
                  if B % tb == 0 and 2 * tb * N * D_in * itemsize <= x_tile_budget]
    if candidates:
        return max(candidates)
    return B  # tiny batch: single full-batch block (block dim == array dim is legal)


def _vmem_limit(tb, N, D_in, out_dim, w_itemsize):
    per_step = (tb * N * D_in * 4              # x tile (f32)
                + tb * N * 4                   # mask tile
                + D_in * 2 * out_dim * w_itemsize
                + 2 * out_dim * 4
                + tb * out_dim * 4)            # output tile
    # double buffering on every operand + headroom for compiler temporaries;
    # cap at 32 MiB so the budget also fits v7x's smaller VMEM / default scope.
    return int(min(max(4 * per_step + (8 << 20), 16 << 20), 32 << 20))


# ----------------------------- wrapper ------------------------------------ #

def graph_level_output(input_set, Wi, bi, Wj, bj, mask=None, *,
                       matmul_dtype=jnp.float32, block_batch=None):
    """input_set: (B, N, D_in) f32; Wi/Wj: (out, D_in) nn.Linear layout;
    bi/bj: (out,); mask: optional (B, N, 1). Returns (B, out) f32.
    matmul_dtype=jnp.bfloat16 enables the bf16-MXU path (v6e/v7x)."""
    B, N, D_in = input_set.shape
    out_dim = Wi.shape[0]

    # Fuse the two Linear layers into one (D_in, 2*out) matmul per tile.
    w_fused = jnp.concatenate([Wi.T, Wj.T], axis=1).astype(matmul_dtype)
    b_fused = jnp.concatenate([bi, bj]).reshape(1, 2 * out_dim).astype(jnp.float32)

    w_itemsize = jnp.dtype(matmul_dtype).itemsize
    tb = block_batch if block_batch is not None else _pick_block_batch(B, N, D_in)
    assert B % tb == 0, "block_batch must divide the batch size"
    grid = (B // tb,)

    x_spec = pl.BlockSpec((tb, N, D_in), lambda b: (b, 0, 0))
    w_spec = pl.BlockSpec((D_in, 2 * out_dim), lambda b: (0, 0))
    b_spec = pl.BlockSpec((1, 2 * out_dim), lambda b: (0, 0))
    o_spec = pl.BlockSpec((tb, out_dim), lambda b: (b, 0))
    out_shape = jax.ShapeDtypeStruct((B, out_dim), jnp.float32)

    cparams = pltpu.CompilerParams(
        dimension_semantics=("parallel",),
        vmem_limit_bytes=_vmem_limit(tb, N, D_in, out_dim, w_itemsize),
    )

    if mask is None:
        # Node collapse happens in-kernel; biases absorb the factor N here.
        return pl.pallas_call(
            _no_mask_kernel,
            out_shape=out_shape,
            grid=grid,
            in_specs=[x_spec, w_spec, b_spec],
            out_specs=o_spec,
            compiler_params=cparams,
        )(input_set, w_fused, b_fused * float(N))

    m_spec = pl.BlockSpec((tb, N, 1), lambda b: (b, 0, 0))
    return pl.pallas_call(
        _mask_kernel,
        out_shape=out_shape,
        grid=grid,
        in_specs=[x_spec, m_spec, w_spec, b_spec],
        out_specs=o_spec,
        compiler_params=cparams,
    )(input_set, mask.astype(jnp.float32), w_fused, b_fused)


# ----------------------------- reference ---------------------------------- #

def _reference(x, Wi, bi, Wj, bj, mask=None):
    if mask is None:
        i_out = x @ Wi.T + bi
        a = jax.nn.softmax(i_out.sum(axis=1), axis=-1)[:, None, :]
        j_out = x @ Wj.T + bj
        return (a * j_out).sum(axis=1)
    xm = x * mask
    i_out = xm @ Wi.T + bi
    a = jax.nn.softmax(i_out, axis=-1)
    j_out = xm @ Wj.T + bj
    return (a * j_out * mask).sum(axis=1)


# ------------------------------- main -------------------------------------- #

if __name__ == "__main__":
    key = jax.random.PRNGKey(0)
    B, N = 16, 16
    node_features = 16          # module's node_features (in_dim)
    D_in = 2 * node_features    # Linear input dim = 2 * in_dim
    out_dim = 32                # module's output_dim

    k1, k2, k3, k4, k5, k6 = jax.random.split(key, 6)
    x = jax.random.normal(k1, (B, N, D_in), dtype=jnp.float32)
    Wi = 0.1 * jax.random.normal(k2, (out_dim, D_in), dtype=jnp.float32)
    bi = 0.1 * jax.random.normal(k3, (out_dim,), dtype=jnp.float32)
    Wj = 0.1 * jax.random.normal(k4, (out_dim, D_in), dtype=jnp.float32)
    bj = 0.1 * jax.random.normal(k5, (out_dim,), dtype=jnp.float32)
    mask = (jax.random.uniform(k6, (B, N, 1)) > 0.3).astype(jnp.float32)

    # f32 matmul path (reference-accurate on all generations).
    out_nomask = graph_level_output(x, Wi, bi, Wj, bj)
    out_mask = graph_level_output(x, Wi, bi, Wj, bj, mask=mask)
    jax.block_until_ready((out_nomask, out_mask))

    ref_nomask = _reference(x, Wi, bi, Wj, bj)
    ref_mask = _reference(x, Wi, bi, Wj, bj, mask)
    # Tolerance: exact in interpret mode; on hardware the in-kernel Mosaic f32
    # matmul and the XLA default-precision reference matmul can differ by up to
    # ~1e-2 absolute due to MXU pass decomposition.
    assert jnp.allclose(out_nomask, ref_nomask, atol=1e-2, rtol=1e-2), "no-mask mismatch"
    assert jnp.allclose(out_mask, ref_mask, atol=1e-2, rtol=1e-2), "mask mismatch"

    # bf16 matmul-operand path (v6e/v7x MXU-native); elementwise math stays f32.
    out_bf16 = graph_level_output(x, Wi, bi, Wj, bj, mask=mask,
                                  matmul_dtype=jnp.bfloat16)
    jax.block_until_ready(out_bf16)
    assert jnp.allclose(out_bf16, ref_mask, atol=1e-1, rtol=1e-1), "bf16 mismatch"

    print("KERNEL_OK")
</pallas_src>

<mosaic_0001>
module attributes {stable_mosaic.version = 11 : i64} {
  func.func @_no_mask_kernel(%arg0: i32, %arg1: memref<8x16x32xf32, #tpu.memory_space<vmem>>, %arg2: memref<32x64xf32, #tpu.memory_space<vmem>>, %arg3: memref<1x64xf32, #tpu.memory_space<vmem>>, %arg4: memref<8x32xf32, #tpu.memory_space<vmem>>) attributes {dimension_semantics = [#tpu.dimension_semantics<parallel>], iteration_bounds = array<i64: 2>, scalar_prefetch = 0 : i64, scratch_operands = 0 : i64, tpu.core_type = #tpu.core_type<tc>, window_params = [{transform_indices = @transform_0, window_bounds = array<i64: 8, 16, 32>}, {pipeline_mode = #tpu.pipeline_mode<synchronous>, transform_indices = @transform_1, window_bounds = array<i64: 32, 64>}, {pipeline_mode = #tpu.pipeline_mode<synchronous>, transform_indices = @transform_2, window_bounds = array<i64: 1, 64>}, {transform_indices = @transform_3, window_bounds = array<i64: 8, 32>}]} {
    %c0 = arith.constant 0 : index
    %c0_0 = arith.constant 0 : index
    %c0_1 = arith.constant 0 : index
    %0 = vector.load %arg1[%c0, %c0_0, %c0_1] : memref<8x16x32xf32, #tpu.memory_space<vmem>>, vector<8x16x32xf32>
    %cst = arith.constant dense<0.000000e+00> : vector<8x32xf32>
    %1 = vector.multi_reduction <add>, %0, %cst [1] : vector<8x16x32xf32> to vector<8x32xf32>
    %c0_2 = arith.constant 0 : index
    %c0_3 = arith.constant 0 : index
    %2 = vector.load %arg2[%c0_2, %c0_3] : memref<32x64xf32, #tpu.memory_space<vmem>>, vector<32x64xf32>
    %cst_4 = arith.constant dense<0.000000e+00> : vector<8x64xf32>
    %3 = tpu.matmul %1, %2, %cst_4 {dimension_numbers = #tpu.dot_dimension_numbers<[1], [0], [0], [1], [0, 0, 1, 1], [], []>} : vector<8x32xf32>, vector<32x64xf32>, vector<8x64xf32> -> vector<8x64xf32>
    %c0_5 = arith.constant 0 : index
    %c0_6 = arith.constant 0 : index
    %4 = vector.load %arg3[%c0_5, %c0_6] : memref<1x64xf32, #tpu.memory_space<vmem>>, vector<1x64xf32>
    %5 = vector.broadcast %4 : vector<1x64xf32> to vector<8x64xf32>
    %6 = arith.addf %3, %5 : vector<8x64xf32>
    %7 = vector.extract_strided_slice %6 {offsets = [0, 0], sizes = [8, 32], strides = [1, 1]} : vector<8x64xf32> to vector<8x32xf32>
    %8 = vector.extract_strided_slice %6 {offsets = [0, 32], sizes = [8, 32], strides = [1, 1]} : vector<8x64xf32> to vector<8x32xf32>
    %cst_7 = arith.constant dense<0xFF800000> : vector<8xf32>
    %9 = vector.multi_reduction <maximumf>, %7, %cst_7 [1] : vector<8x32xf32> to vector<8xf32>
    %10 = vector.shape_cast %9 : vector<8xf32> to vector<8x1xf32>
    %11 = vector.broadcast %10 : vector<8x1xf32> to vector<8x32xf32>
    %12 = arith.subf %7, %11 : vector<8x32xf32>
    %13 = math.exp %12 : vector<8x32xf32>
    %cst_8 = arith.constant dense<0.000000e+00> : vector<8xf32>
    %14 = vector.multi_reduction <add>, %13, %cst_8 [1] : vector<8x32xf32> to vector<8xf32>
    %15 = vector.shape_cast %14 : vector<8xf32> to vector<8x1xf32>
    %16 = vector.broadcast %15 : vector<8x1xf32> to vector<8x32xf32>
    %17 = arith.divf %13, %16 : vector<8x32xf32>
    %18 = arith.mulf %17, %8 : vector<8x32xf32>
    %c0_9 = arith.constant 0 : index
    %c0_10 = arith.constant 0 : index
    %19 = vector.load %arg4[%c0_9, %c0_10] : memref<8x32xf32, #tpu.memory_space<vmem>>, vector<8x32xf32>
    tpu.vector_store %arg4[%c0_9, %c0_10], %18 {strides = array<i32>} : memref<8x32xf32, #tpu.memory_space<vmem>>, vector<8x32xf32>,
    return
  }
  func.func @transform_0(%arg0: i32) -> (i32, i32, i32) {
    %c0_i32 = arith.constant 0 : i32
    %c0_i32_0 = arith.constant 0 : i32
    %c0_i32_1 = arith.constant 0 : i32
    return %arg0, %c0_i32, %c0_i32_0 : i32, i32, i32
  }
  func.func @transform_1(%arg0: i32) -> (i32, i32) {
    %c0_i32 = arith.constant 0 : i32
    %c0_i32_0 = arith.constant 0 : i32
    %c0_i32_1 = arith.constant 0 : i32
    return %c0_i32, %c0_i32_0 : i32, i32
  }
  func.func @transform_2(%arg0: i32) -> (i32, i32) {
    %c0_i32 = arith.constant 0 : i32
    %c0_i32_0 = arith.constant 0 : i32
    %c0_i32_1 = arith.constant 0 : i32
    return %c0_i32, %c0_i32_0 : i32, i32
  }
  func.func @transform_3(%arg0: i32) -> (i32, i32) {
    %c0_i32 = arith.constant 0 : i32
    %c0_i32_0 = arith.constant 0 : i32
    return %arg0, %c0_i32 : i32, i32
  }
}

</mosaic_0001>

<bundles_post_ra>
// kernel: tpu_custom_call.1
= control target key start
LH: loop header
LB: loop body
LE: loop exit
PB: predicated region body
PF: predicated region fallthrough
CT: control target
= control target key end

     0   :  { %8 = vsyncpa [#allocation3], 0  ;;  %s1029_s0 = inlined_call_operand.hbm [shape: f32[16,16,32], index: 0, kind: input, shape index: {}]   ;;  %s1030_s1 = inlined_call_operand.hbm [shape: f32[32,64], index: 1, kind: input, shape index: {}]   ;;  %s1031_s2 = inlined_call_operand.vmem [shape: f32[1,64], index: 2, kind: input, shape index: {}]   ;;  %s1032_s3 = inlined_call_operand.hbm [shape: f32[16,32], index: 3, kind: output, shape index: {}]  }
   0x1   :  { %10 = vsyncpa [#allocation3 + $0x1], 0 }
   0x2   :  { %11 = vsyncpa [#allocation6], 0 }
   0x3   :  { %12 = vsyncpa [#allocation4], 0 }
   0x4   :  { %14 = vsyncpa [#allocation4 + $0x1], 0  ;;  %s779_s12 = smov 0   ;;  %s781_s13 = smov 0  }
   0x5   :  { %s783_s14 = smov 0   ;;  %s785_s15 = smov 0  }
   0x6 LB: > { %s800_s16 = sadd.s32 4294967295, %s748_s15   ;;  %s511_s17 = sadd.s32 4294967294, %s748_s15   ;;  %s748_s15 = sphi %s785_s15, %s1052_s15   ;;  %s744_s14 = sphi %s783_s14, %s1051_s14   ;;  %s740_s13 = sphi %s781_s13, %s1050_s13   ;;  %s736_s12 = sphi %s779_s12, %s1049_s12  }
   0x7   : > { %p40_p0 = scmp.ne.s32.totalorder %s740_s13, %s736_s12  ;;  %p1033_p1 = scmp.eq.s32.totalorder %s800_s16, 0 }
   0x8   : > { %p112_p3 = scmp.eq.s32.totalorder %s511_s17, 1  ;;  %p512_p5 = scmp.ge.s32.totalorder %s748_s15, 1 }
   0x9   : > { %p809_p4 = por %p1033_p1, %p40_p0  ;;  %p119_p7 = scmp.lt.s32.totalorder %s748_s15, 3 }
   0xa   : > { %p814_p6 = por %p112_p3, %p40_p0  ;;  %s750_s21 = smov [#allocation5]  }
   0xb   : > { %s1036_s18 = scalar_select %p809_p4, 1, 0 }
   0xc   : > { %s1037_s19 = scalar_select %p814_p6, 1, 0 }
   0xd   : > { %p819_p8 = pnand %p512_p5, %p119_p7  ;;  %s131_s22 = sshll.u32 %s750_s21, 4  ;;  %s823_s22 = int_to_ptr.vmem [resolvable:$true] %s131_s22 }
   0xe   : > { %s835_s24 = sadd.s32 1, %s748_s15   ;;  %s27_s25 = sadd.s32 1, %s744_s14 }
   0xf   : > { %s1038_s20 = scalar_select %p819_p8, 1, 0 }
  0x10   : > { %p561_p9 = pneg %p819_p8  ;;  %s24_s26 = ssub.s32 %s748_s15, %s835_s24 }
  0x11   : > { %s620_s29 = scalar_lea.hbm %s1030_s1, 512 }
  0x12   : > { %p830_p11 = pnand %p561_p9, %p1033_p1  ;;  %p621_p12 = scmp.ne.s32.totalorder %s1030_s1, %s620_s29 }
  0x13   : > { %p627_p5 = scmp.lt.u32.totalorder %s620_s29, %s1030_s1 }
  0x14   : > { %p622_p13 = pneg %p830_p11 }
  0x16   : > { %p623_p0 = pnand %p622_p13, %p621_p12 }
  0x18   : > { %p624_p3 = pneg %p623_p0 }
  0x1a   : > { %p629_p7 = pnand %p627_p5, %p624_p3 }
  0x1c   : > { %632 = shalt.err (!%p629_p7)
}
  0x1d   : > { %s633_s7 = scalar_lea.vmem %s823_s22, 512  ;;  %p641_p2 = scmp.lt.s32.totalorder %s823_s22, %s823_s22 }
  0x1e   : > { %p634_p9 = scmp.ne.s32.totalorder %s823_s22, %s633_s7  ;;  %p642_p6 = scmp.lt.s32.totalorder %s633_s7, %s633_s7 }
  0x20   : > { %p636_p10 = pnand %p634_p9, %p622_p13  ;;  %p643_p4 = por %p642_p6, %p641_p2 }
  0x22   : > { %p637_p1 = pneg %p636_p10 }
  0x24   : > { %p644_p8 = pnand %p643_p4, %p637_p1 }
  0x26   : > { %647 = shalt.err (!%p644_p8)
}
  0x27   : > { %s751_s8 = smov 128   ;;  %s752_s9 = smov 8  }
  0x28   : > { %564 = dma.hbm_to_vmem [thread:$0]  (!%p830_p11), %s1030_s1, 512, %s823_s22, [#allocation6], %s751_s8, %s751_s8, %s752_s9  }
  0x29   : > { %p25_p1 = scmp.eq.s32.totalorder %s24_s26, 0  ;;  %p34_p2 = scmp.ne.s32.totalorder %s744_s14, %s740_s13 }
  0x2a   : > { %p35_p4 = scmp.eq.s32.totalorder %s748_s15, 0  ;;  %p574_p6 = scmp.lt.s32.totalorder %s748_s15, 2 }
  0x2b   : > { %s869_s17 = scalar_select %p25_p1, %s744_s14, %s27_s25  }
  0x2c   : > { %p36_p8 = por %p35_p4, %p34_p2  ;;  %p1040_p10 = scmp.eq.s32.totalorder %s800_s16, 1 }
  0x2d   : > { %s148_s23 = sand.u32 1, %s744_s14   ;;  %s530_s27 = sshll.u32 %s748_s15, 11 }
  0x2e   : > { %p873_p12 = por %p1040_p10, %p34_p2  ;;  %s515_s28 = sshll.u32 %s148_s23, 7 }
  0x2f   : > { %s882_s4 = scalar_lea.hbm %s1029_s0, %s530_s27  ;;  %s152_s22 = scalar_lea.vmem [#allocation2], %s515_s28 }
  0x30   : > { %s160_s25 = sshll.u32 %s152_s22, 4  ;;  %p884_p11 = pnand %p574_p6, %p36_p8  ;;  %s888_s25 = int_to_ptr.vmem [resolvable:$true] %s160_s25 }
  0x31   : > { %s890_s5 = scalar_lea.sflag [#allocation3], %s148_s23  ;;  %s648_s6 = scalar_lea.hbm %s882_s4, 2048 }
  0x32   : > { %p649_p13 = scmp.ne.s32.totalorder %s882_s4, %s648_s6  ;;  %p650_p0 = pneg %p884_p11 }
  0x33   : > { %s653_s11 = scalar_lea.hbm %s1029_s0, 4096  ;;  %p654_p7 = scmp.lt.u32.totalorder %s882_s4, %s1029_s0 }
  0x34   : > { %p651_p3 = pnand %p650_p0, %p649_p13  ;;  %p655_p9 = scmp.lt.u32.totalorder %s653_s11, %s648_s6 }
  0x35   : > { %p657_p2 = scmp.lt.u32.totalorder %s648_s6, %s882_s4 }
  0x36   : > { %p652_p5 = pneg %p651_p3  ;;  %p656_p1 = por %p655_p9, %p654_p7 }
  0x38   : > { %p658_p4 = por %p657_p2, %p656_p1 }
  0x3a   : > { %p659_p6 = pnand %p658_p4, %p652_p5 }
  0x3c   : > { %662 = shalt.err (!%p659_p6)
}
  0x3d   : > { %s663_s23 = scalar_lea.vmem %s888_s25, 2048  ;;  %s753_s29 = smov [#allocation2]  }
  0x3e   : > { %p664_p8 = scmp.ne.s32.totalorder %s888_s25, %s663_s23  ;;  %s668_s30 = sshll.u32 %s753_s29, 4  ;;  %s669_s30 = int_to_ptr.vmem [resolvable:$false] %s668_s30 }
  0x3f   : > { %s670_s22 = scalar_lea.vmem %s669_s30, 4096  ;;  %p671_p3 = scmp.lt.s32.totalorder %s888_s25, %s669_s30 }
  0x40   : > { %p666_p10 = pnand %p664_p8, %p650_p0  ;;  %p672_p7 = scmp.lt.s32.totalorder %s670_s22, %s663_s23 }
  0x42   : > { %p667_p13 = pneg %p666_p10  ;;  %p673_p9 = por %p672_p7, %p671_p3 }
  0x44   : > { %p674_p1 = pnand %p673_p9, %p667_p13 }
  0x46   : > { %677 = shalt.err (!%p674_p1)
}
  0x47   : > { %568 = dma.hbm_to_vmem [thread:$0]  (!%p884_p11), %s882_s4, 2048, %s888_s25, %s890_s5, %s751_s8, %s751_s8, %s752_s9  }
  0x48   : > { %p1043_p0 = scmp.ne.s32.totalorder %s1038_s20, 0 }
  0x49   : > { %s924_s6 = sand.u32 (!%p1043_p0), 1, %s740_s13   ;;  %p1044_p5 = scmp.ne.s32.totalorder (!%p1043_p0), %s1036_s18, 0 }
  0x4a   : > { %172 = sbr.rel (%p1043_p0) target bundleno = 659 (0x293), region = 32  ;;  %s520_s7 = sshll.u32 (!%p1043_p0), %s924_s6, 7 }
  0x4b   : > { %s175_s10 = scalar_lea.sflag (!%p1043_p0), [#allocation3], %s924_s6  ;;  %s928_s11 = scalar_lea.vmem (!%p1043_p0), [#allocation2], %s520_s7 }
  0x51   : > { %723 = dma.done.wait (%p1044_p5), %s175_s10, 2048  }
  0x52   : > { %725 = vsyncadd (%p1044_p5), %s175_s10, 4294965248  ;;  %p1045_p11 = scmp.eq.s32.totalorder %s800_s16, 0 }
  0x54   : > { %727 = dma.done.wait (%p1045_p11), [#allocation6], 512   ;;  %p1046_p2 = pmov %p1045_p11 }
  0x55   : > { %v754_v0 = vmov 0.0|0.0   ;;  %vm755_vm0 = vmmov 0   ;;  %v756_v1 = vmov 0.0   ;;  %vm222_vm1 = vcmask 261120   ;;  %v295_v2 = vld [vmem:[#allocation5] sm:$0xff]  ;;  %v296_v3 = vld [vmem:[#allocation5 + $0x8] sm:$0xff] }
  0x56   : > { %729 = vsyncadd (%p1046_p2), [#allocation6], 4294966784  ;;  %547 = vmatprep.subr.bf16.mxu0 %v754_v0  ;;  %544 = vmatprep.mubr.msk.f32.mxu0 %vm755_vm0, %v756_v1  ;;  %v297_v4 = vld [vmem:[#allocation5 + $0x10] sm:$0xff]  ;;  %v548_v5 = vpack.c.bf16 %v296_v3, %v295_v2  ;;  %v298_v6 = vld [vmem:[#allocation5 + $0x18] sm:$0xff]  ;;  %vm314_vm2 = vcmask 1041409   ;;  %vm316_vm3 = vcmask 1042434  }
  0x57   : > { %v206_v7 = vld [vmem:[%s928_s11] sm:$0xff]  ;;  %v207_v8 = vld [vmem:[%s928_s11 + $0x8] sm:$0xff]  ;;  %v551_v9 = vpack.c.bf16 %v298_v6, %v297_v4  ;;  %v208_v10 = vld [vmem:[%s928_s11 + $0x10] sm:$0xff]  ;;  %vm318_vm4 = vcmask 1043459   ;;  %vm320_vm5 = vcmask 1044484   ;;  %vm322_vm6 = vcmask 1045509  }
  0x58   : > { %v209_v11 = vld [vmem:[%s928_s11 + $0x18] sm:$0xff]  ;;  %v210_v12 = vld [vmem:[%s928_s11 + $0x20] sm:$0xff]  ;;  %v223_v13 = vsel %vm222_vm1, %v206_v7, 0.0  ;;  %v224_v14 = vsel %vm222_vm1, %v207_v8, 0.0  ;;  %549 = vmatpush3.bf16.msra.mxu0 %v548_v5  ;;  %v211_v15 = vld [vmem:[%s928_s11 + $0x28] sm:$0xff]  ;;  %v232_v19 = vsel %vm222_vm1, %v208_v10, 0.0 }
  0x59   : > { %v212_v16 = vld [vmem:[%s928_s11 + $0x30] sm:$0xff]  ;;  %v213_v17 = vld [vmem:[%s928_s11 + $0x38] sm:$0xff]  ;;  %v225_v18 = vadd.f32 %v224_v14, %v223_v13  ;;  %v233_v20 = vsel %vm222_vm1, %v209_v11, 0.0  ;;  %v241_v21 = vsel %vm222_vm1, %v210_v12, 0.0  ;;  %550 = vmatprep.subr.bf16.mxu0 %v754_v0  ;;  %v214_v22 = vld [vmem:[%s928_s11 + $0x40] sm:$0xff]  ;;  %v242_v26 = vsel %vm222_vm1, %v211_v15, 0.0 }
  0x5a   : > { %v215_v23 = vld [vmem:[%s928_s11 + $0x48] sm:$0xff]  ;;  %v216_v24 = vld [vmem:[%s928_s11 + $0x50] sm:$0xff]  ;;  %v234_v25 = vadd.f32 %v233_v20, %v232_v19  ;;  %v250_v27 = vsel %vm222_vm1, %v212_v16, 0.0  ;;  %v251_v28 = vsel %vm222_vm1, %v213_v17, 0.0  ;;  %v217_v29 = vld [vmem:[%s928_s11 + $0x58] sm:$0xff]  ;;  %v243_v33 = vadd.f32 %v242_v26, %v241_v21  ;;  %s757_s8 = smov 96  }
  0x5b   : > { %v218_v30 = vld [vmem:[%s928_s11 + $0x60] sm:$0xff]  ;;  %v219_v31 = vld [vmem:[%s928_s11 + $0x68] sm:$0xff]  ;;  %v226_v32 = vrot.slane %v225_v18, 4  ;;  %v252_v34 = vadd.f32 %v251_v28, %v250_v27  ;;  %v259_v35 = vsel %vm222_vm1, %v214_v22, 0.0  ;;  %v260_v37 = vsel %vm222_vm1, %v215_v23, 0.0  ;;  %v220_v40 = vld [vmem:[%s928_s11 + $0x70] sm:$0xff] }
  0x5c   : > { %v235_v36 = vrot.slane %v234_v25, 4  ;;  %v268_v38 = vsel %vm222_vm1, %v216_v24, 0.0  ;;  %v269_v39 = vsel %vm222_vm1, %v217_v29, 0.0  ;;  %552 = vmatpush3.bf16.msra.mxu0 %v551_v9  ;;  %v244_v42 = vrot.slane %v243_v33, 4  ;;  %v221_v49 = vld [vmem:[%s928_s11 + $0x78] sm:$0xff]  ;;  %s522_s9 = sshll.u32 %s924_s6, 3 }
  0x5d   : > { %v227_v41 = vadd.f32 %v226_v32, %v225_v18  ;;  %v253_v43 = vrot.slane %v252_v34, 4  ;;  %v261_v44 = vadd.f32 %v260_v37, %v259_v35  ;;  %v270_v46 = vadd.f32 %v269_v39, %v268_v38  ;;  %v523_v39 = vld [vmem:[%s1031_s2] ss:$0 sm:$0xff]  ;;  %s526_s4 = sshll.u32 %s800_s16, 7  ;;  %s204_s25 = scalar_lea.vmem [#allocation7], %s522_s9 }
  0x5e   : > { %v236_v45 = vadd.f32 %v235_v36, %v234_v25  ;;  %v277_v47 = vsel %vm222_vm1, %v218_v30, 0.0  ;;  %v278_v48 = vsel %vm222_vm1, %v219_v31, 0.0  ;;  %v245_v51 = vadd.f32 %v244_v42, %v243_v33  ;;  %s431_s26 = sshll.u32 %s204_s25, 4  ;;  %s984_s28 = scalar_lea.hbm %s1032_s3, %s526_s4  ;;  %s986_s26 = int_to_ptr.vmem [resolvable:$true] %s431_s26 }
  0x5f   : > { %v228_v50 = vrot.slane %v227_v41, 2  ;;  %v254_v52 = vadd.f32 %v253_v43, %v252_v34  ;;  %v262_v53 = vrot.slane %v261_v44, 4  ;;  %v271_v55 = vrot.slane %v270_v46, 4  ;;  %s418_s23 = scalar_lea.sflag [#allocation4], %s924_s6  ;;  %s678_s29 = scalar_lea.vmem %s986_s26, 128 }
  0x60   : > { %v237_v54 = vrot.slane %v236_v45, 2  ;;  %v279_v56 = vadd.f32 %v278_v48, %v277_v47  ;;  %v286_v57 = vsel %vm222_vm1, %v220_v40, 0.0  ;;  %v246_v59 = vrot.slane %v245_v51, 2  ;;  %p679_p4 = scmp.ne.s32.totalorder %s986_s26, %s678_s29  ;;  %s758_s16 = smov [#allocation7]  }
  0x61   : > { %v229_v58 = vadd.f32 %v228_v50, %v227_v41  ;;  %v255_v60 = vrot.slane %v254_v52, 2  ;;  %v263_v61 = vadd.f32 %v262_v53, %v261_v44  ;;  %v272_v63 = vadd.f32 %v271_v55, %v270_v46  ;;  %s682_s30 = sshll.u32 %s758_s16, 4  ;;  %s683_s30 = int_to_ptr.vmem [resolvable:$false] %s682_s30 }
  0x62   : > { %v238_v62 = vadd.f32 %v237_v54, %v236_v45  ;;  %v280_v0 = vrot.slane %v279_v56, 4  ;;  %v287_v1 = vsel %vm222_vm1, %v221_v49, 0.0  ;;  %v247_v3 = vadd.f32 %v246_v59, %v245_v51  ;;  %p680_p6 = pnand %p679_p4, %p873_p12  ;;  %s684_s22 = scalar_lea.vmem %s683_s30, 256 }
  0x63   : > { %v230_v2 = vrot.slane %v229_v58, 1  ;;  %v256_v4 = vadd.f32 %v255_v60, %v254_v52  ;;  %v264_v5 = vrot.slane %v263_v61, 2  ;;  %v273_v7 = vrot.slane %v272_v63, 2  ;;  %p685_p10 = scmp.lt.s32.totalorder %s986_s26, %s683_s30  ;;  %p686_p13 = scmp.lt.s32.totalorder %s684_s22, %s678_s29 }
  0x64   : > { %v239_v6 = vrot.slane %v238_v62, 1  ;;  %v281_v8 = vadd.f32 %v280_v0, %v279_v56  ;;  %v288_v9 = vadd.f32 %v287_v1, %v286_v57  ;;  %v248_v11 = vrot.slane %v247_v3, 1  ;;  %p681_p8 = pneg %p680_p6 }
  0x65   : > { %v231_v10 = vadd.f32 %v230_v2, %v229_v58  ;;  %v257_v12 = vrot.slane %v256_v4, 1  ;;  %v265_v13 = vadd.f32 %v264_v5, %v263_v61  ;;  %v274_v15 = vadd.f32 %v273_v7, %v272_v63  ;;  %p687_p3 = por %p686_p13, %p685_p10 }
  0x66   : > { %v240_v14 = vadd.f32 %v239_v6, %v238_v62  ;;  %v282_v16 = vrot.slane %v281_v8, 2  ;;  %v289_v17 = vrot.slane %v288_v9, 4  ;;  %v249_v18 = vadd.f32 %v248_v11, %v247_v3 }
  0x67   : > { %v258_v19 = vadd.f32 %v257_v12, %v256_v4  ;;  %v266_v20 = vrot.slane %v265_v13, 1  ;;  %v275_v21 = vrot.slane %v274_v15, 1  ;;  %vm324_vm7 = vcmask 1046534   ;;  %p688_p7 = pnand %p687_p3, %p681_p8 }
  0x68   : > { %v283_v22 = vadd.f32 %v282_v16, %v281_v8  ;;  %v290_v23 = vadd.f32 %v289_v17, %v288_v9  ;;  %v315_v24 = vsel %vm314_vm2, %v240_v14, %v231_v10  ;;  %vm326_vm8 = vcmask 1047559  }
  0x69   : > { %v267_v25 = vadd.f32 %v266_v20, %v265_v13  ;;  %v317_v26 = vsel %vm316_vm3, %v249_v18, %v315_v24  ;;  %v276_v27 = vadd.f32 %v275_v21, %v274_v15 }
  0x6a   : > { %v284_v28 = vrot.slane %v283_v22, 1  ;;  %v291_v29 = vrot.slane %v290_v23, 2  ;;  %v319_v30 = vsel %vm318_vm4, %v258_v19, %v317_v26 }
  0x6b   : > { %v321_v31 = vsel %vm320_vm5, %v267_v25, %v319_v30 }
  0x6c   : > { %v285_v32 = vadd.f32 %v284_v28, %v283_v22  ;;  %v292_v33 = vadd.f32 %v291_v29, %v290_v23  ;;  %v323_v34 = vsel %vm322_vm6, %v276_v27, %v321_v31 }
  0x6e   : > { %v293_v35 = vrot.slane %v292_v33, 1  ;;  %v325_v36 = vsel %vm324_vm7, %v285_v32, %v323_v34 }
  0x70   : > { %v294_v37 = vadd.f32 %v293_v35, %v292_v33 }
  0x72   : > { %v327_v38 = vsel %vm326_vm8, %v294_v37, %v325_v36 }
  0x73   : > { %545 = vmatmul.mubr.msk.f32.vlgmr.msra.gmra.mrb[0].mxu0 %vm222_vm1, %v327_v38 }
 0x146   : > { %v396_v40 = vpop.f32.mrb[0].mxu0 }
 0x147   : > { %v397_v41 = vadd.f32 %v523_v39, %v396_v40  ;;  %v546_v42 = vpop.f32.mrb[1].mxu0 }
 0x149   : > { %412 = vrot.lane.b32.xlu1 %v397_v41, %s757_s8  ;;  %v400_v43 = vsel %vm222_vm1, %v397_v41, -inf }
 0x14a   : > { %401 = vmax.xlane.f32.xlu0 %v400_v43 }
 0x1bb   : > { %v413_v52 = vpop.permute.xlu1 %412 }
 0x1d7   : > { %v402_v44 = vpop.xlane.xlu0 %401 }
 0x1d8   : > { %v403_v45 = vsub.f32 %v397_v41, %v402_v44 }
 0x1da   : > { %v404_v46 = vmul.f32 1.442695, %v403_v45 }
 0x1dc   : > { %616 = vpow2.f32 %v404_v46 }
 0x1e6   : > { %v617_v47 = vpop.eup %616 }
 0x1e7   : > { %v406_v48 = vsel %vm222_vm1, %v617_v47, 0.0 }
 0x1e8   : > { %407 = vadd.xlane.f32.xlu0 %v406_v48 }
 0x275   : > { %v408_v49 = vpop.xlane.xlu0 %407 }
 0x276   : > { %618 = vrcp.f32 %v408_v49 }
 0x280   : > { %v619_v50 = vpop.eup %618 }
 0x281   : > { %v410_v51 = vmul.f32 %v619_v50, %v617_v47 }
 0x283   : > { %v415_v53 = vmul.f32 %v413_v52, %v410_v51 }
 0x285   : > { %416 = vst.msk [vmem:[%s204_s25] sm:$0xff] %vm222_vm1, %v415_v53 }
 0x286   : > { %691 = shalt.err (!%p688_p7)
}
 0x287   : > { %s692_s6 = scalar_lea.hbm %s984_s28, 128  ;;  %s696_s11 = scalar_lea.hbm %s1032_s3, 256 }
 0x288   : > { %p693_p9 = scmp.ne.s32.totalorder %s984_s28, %s692_s6  ;;  %p697_p5 = scmp.lt.u32.totalorder %s984_s28, %s1032_s3 }
 0x289   : > { %p698_p11 = scmp.lt.u32.totalorder %s696_s11, %s692_s6  ;;  %p700_p4 = scmp.lt.u32.totalorder %s692_s6, %s984_s28 }
 0x28a   : > { %p694_p1 = pnand %p693_p9, %p873_p12 }
 0x28b   : > { %p699_p2 = por %p698_p11, %p697_p5 }
 0x28c   : > { %p695_p0 = pneg %p694_p1 }
 0x28d   : > { %p701_p6 = por %p700_p4, %p699_p2 }
 0x28f   : > { %p702_p8 = pnand %p701_p6, %p695_p0 }
 0x291   : > { %705 = shalt.err (!%p702_p8)
}
 0x292   : > { %559 = dma.vmem_to_hbm [thread:$0]  (%p873_p12), %s986_s26, 128, %s984_s28, %s418_s23  }
 0x293 PF: > { %s443_s8 = sand.u32 1, %s736_s12   ;;  %p1047_p10 = scmp.ne.s32.totalorder %s1037_s19, 0 }
 0x294   : > { %p1048_p13 = scmp.ge.s32.totalorder %s748_s15, 2  ;;  %s444_s9 = scalar_lea.sflag [#allocation4], %s443_s8 }
 0x296   : > { %p570_p3 = pnand %p1048_p13, %p1047_p10 }
 0x298   : > { %731 = dma.done.wait (!%p570_p3), %s444_s9, 128  }
 0x299   : > { %733 = vsyncadd (!%p570_p3), %s444_s9, 4294967168  ;;  %p17_p7 = scmp.ge.s32.totalorder %s835_s24, 4   ;;  %s1049_s12 = smov %s740_s13 }
 0x29a   : > { %s1050_s13 = smov %s744_s14  ;;  %s1051_s14 = smov %s869_s17 }
 0x29b   : > { %s1052_s15 = smov %s835_s24  ;;  %19 = sbr.rel (!%p17_p7) target bundleno = 6 (0x6), region = 81 }
 0x2a2   :  { %449 = vsyncpa [#allocation3], 1 }
 0x2a3   :  { %451 = vsyncpa [#allocation3 + $0x1], 1 }
 0x2a4   :  { %452 = vsyncpa [#allocation6], 1 }
 0x2a5   :  { %453 = vsyncpa [#allocation4], 1 }
 0x2a6   :  { %455 = vsyncpa [#allocation4 + $0x1], 1 }

</bundles_post_ra>
